<compile_context>
chip_gen: v7x
topology: tpu7x:2x2x1
jax: 0.10.0
libtpu: 0.0.40
codegen_flags: <defaults>
</compile_context>

<pallas_src>
import jax
import jax.numpy as jnp
import numpy as np
from jax.experimental import pallas as pl
from jax.experimental.pallas import tpu as pltpu


def _gather_row_kernel(rows_ref, img_ref, o_ref):
    # rows_ref : SMEM (n,) int32 flat row indices (scalar prefetch); consumed
    #            by the data-dependent index_map, unused in the body.
    # img_ref  : VMEM (1, 1, C) -- the one gathered channel row for this step.
    # o_ref    : VMEM (1, 1, C) -- output row for this point.
    del rows_ref
    o_ref[...] = img_ref[...]


def crop_function(imgs, batch_cpoints, batch_npoints):
    """Pallas equivalent of Crop_function.forward.

    imgs:            (B, C, H, W) float array (NCHW, like the torch module)
    batch_*points:   (B, P, 2) or (B, 2); point[..., 0] = x, point[..., 1] = y
    Returns (crops, c_len, length) with crops of shape (length, C).
    """
    imgs = jnp.asarray(imgs)
    B, C, H, W = (int(s) for s in imgs.shape)

    def expand(pts):
        pts = jnp.asarray(pts)
        if pts.ndim == 2 and pts.shape[1] == 2:
            # `points.shape == torch.Size([2])` branch: one point per image
            return pts[:, None, :]
        return pts

    cpts = expand(batch_cpoints)
    npts = expand(batch_npoints)
    Pc, Pn = int(cpts.shape[1]), int(npts.shape[1])
    c_len = B * Pc
    length = c_len + B * Pn
    if length == 0:
        # type-consistent empty result (torch returns an empty python list)
        return jnp.zeros((0, C), imgs.dtype), 0, 0

    # crop ordering matches the torch module: all cancer crops (per image
    # order), then all non-cancer crops.
    b_idx = jnp.concatenate([
        jnp.repeat(jnp.arange(B, dtype=jnp.int32), Pc),
        jnp.repeat(jnp.arange(B, dtype=jnp.int32), Pn),
    ])
    pts = jnp.concatenate([cpts.reshape(-1, 2), npts.reshape(-1, 2)], axis=0)
    pts = pts.astype(jnp.int32)            # point.long()
    x_idx = pts[:, 0]
    y_idx = pts[:, 1]

    # single flat row index, computed vectorized in the wrapper; clamped since
    # the kernel performs no bounds checking on the gathered row.
    rows = b_idx * (H * W) + y_idx * W + x_idx
    rows = jnp.clip(rows, 0, B * H * W - 1).astype(jnp.int32)

    # TODO(synk): fold this NCHW->channels-last relayout into the producer of
    # `imgs` (or accept NHWC upstream); it is the only remaining full-image
    # HBM traffic — the Pallas gather itself only touches n*C elements.
    img_rows = jnp.transpose(imgs, (0, 2, 3, 1)).reshape(B * H * W, 1, C)

    n = int(length)
    out = pl.pallas_call(
        _gather_row_kernel,
        out_shape=jax.ShapeDtypeStruct((n, 1, C), imgs.dtype),
        grid_spec=pltpu.PrefetchScalarGridSpec(
            num_scalar_prefetch=1,
            grid=(n,),
            # data-dependent index_map: DMA only row rows[i] for grid step i
            in_specs=[pl.BlockSpec((1, 1, C), lambda i, r: (r[i], 0, 0))],
            out_specs=pl.BlockSpec((1, 1, C), lambda i, r: (i, 0, 0)),
        ),
        compiler_params=pltpu.CompilerParams(
            dimension_semantics=("parallel",)),
    )(rows, img_rows)

    return out.reshape(n, C), c_len, length


if __name__ == "__main__":
    key = jax.random.PRNGKey(0)
    k1, k2, k3 = jax.random.split(key, 3)

    B, C, H, W = 2, 4, 16, 16
    Pc, Pn = 3, 2
    imgs = jax.random.normal(k1, (B, C, H, W), dtype=jnp.float32)
    cpoints = jax.random.randint(k2, (B, Pc, 2), 0, W, dtype=jnp.int32)
    npoints = jax.random.randint(k3, (B, Pn, 2), 0, W, dtype=jnp.int32)

    crops, c_len, length = crop_function(imgs, cpoints, npoints)
    crops = jax.block_until_ready(crops)

    # pure-numpy reference with the exact torch-module semantics
    imgs_np = np.asarray(imgs)
    ref = []
    for pts_all in (np.asarray(cpoints), np.asarray(npoints)):
        for b in range(B):
            for p in pts_all[b]:
                ref.append(imgs_np[b, :, int(p[1]), int(p[0])])
    ref = np.stack(ref)

    assert c_len == B * Pc and length == B * (Pc + Pn)
    assert crops.shape == (length, C)
    assert np.allclose(np.asarray(crops), ref)

    # also exercise the single-point-per-image branch (points.shape == [2])
    crops1, c1, l1 = crop_function(imgs, cpoints[:, 0, :], npoints[:, 0, :])
    crops1 = jax.block_until_ready(crops1)
    assert c1 == B and l1 == 2 * B and crops1.shape == (2 * B, C)
    ref1 = []
    for pts_all in (np.asarray(cpoints)[:, 0, :], np.asarray(npoints)[:, 0, :]):
        for b in range(B):
            p = pts_all[b]
            ref1.append(imgs_np[b, :, int(p[1]), int(p[0])])
    assert np.allclose(np.asarray(crops1), np.stack(ref1))

    print("KERNEL_OK")
</pallas_src>

<mosaic_0001>
module attributes {stable_mosaic.version = 11 : i64} {
  func.func @_gather_row_kernel(%arg0: i32, %arg1: memref<10xi32, #tpu.memory_space<smem>>, %arg2: memref<1x1x4xf32, #tpu.memory_space<vmem>>, %arg3: memref<1x1x4xf32, #tpu.memory_space<vmem>>) attributes {dimension_semantics = [#tpu.dimension_semantics<parallel>], iteration_bounds = array<i64: 10>, scalar_prefetch = 1 : i64, scratch_operands = 0 : i64, tpu.core_type = #tpu.core_type<tc>, window_params = [{transform_indices = @transform_0, window_bounds = array<i64: 1, 1, 4>}, {transform_indices = @transform_1, window_bounds = array<i64: 1, 1, 4>}]} {
    %c0 = arith.constant 0 : index
    %c0_0 = arith.constant 0 : index
    %c0_1 = arith.constant 0 : index
    %0 = vector.load %arg2[%c0, %c0_0, %c0_1] : memref<1x1x4xf32, #tpu.memory_space<vmem>>, vector<1x1x4xf32>
    %c0_2 = arith.constant 0 : index
    %c0_3 = arith.constant 0 : index
    %c0_4 = arith.constant 0 : index
    %1 = vector.load %arg3[%c0_2, %c0_3, %c0_4] : memref<1x1x4xf32, #tpu.memory_space<vmem>>, vector<1x1x4xf32>
    tpu.vector_store %arg3[%c0_2, %c0_3, %c0_4], %0 {strides = array<i32>} : memref<1x1x4xf32, #tpu.memory_space<vmem>>, vector<1x1x4xf32>,
    return
  }
  func.func @transform_0(%arg0: i32, %arg1: memref<10xi32, #tpu.memory_space<smem>>) -> (i32, i32, i32) {
    %0 = arith.index_cast %arg0 : i32 to index
    %1 = memref.load %arg1[%0] : memref<10xi32, #tpu.memory_space<smem>>
    %c0_i32 = arith.constant 0 : i32
    %c0_i32_0 = arith.constant 0 : i32
    %c0_i32_1 = arith.constant 0 : i32
    return %1, %c0_i32, %c0_i32_0 : i32, i32, i32
  }
  func.func @transform_1(%arg0: i32, %arg1: memref<10xi32, #tpu.memory_space<smem>>) -> (i32, i32, i32) {
    %c0_i32 = arith.constant 0 : i32
    %c0_i32_0 = arith.constant 0 : i32
    %c0_i32_1 = arith.constant 0 : i32
    return %arg0, %c0_i32, %c0_i32_0 : i32, i32, i32
  }
}

</mosaic_0001>

<bundles_post_ra>
// kernel: tpu_custom_call.1
= control target key start
LH: loop header
LB: loop body
LE: loop exit
PB: predicated region body
PF: predicated region fallthrough
CT: control target
= control target key end

     0   :  { %s231_s0 = inlined_call_operand.vmem [shape: s32[10], index: 0, kind: input, shape index: {}]   ;;  %s232_s1 = inlined_call_operand.vmem [shape: f32[512,1,4], index: 1, kind: input, shape index: {}]   ;;  %s233_s2 = inlined_call_operand.vmem [shape: f32[10,1,4], index: 2, kind: output, shape index: {}]  }
   0x1   :  { %s7_s11 = sshll.u32 %s231_s0, 4  ;;  %s8_s11 = int_to_ptr.vmem [resolvable:$true] %s7_s11 }
   0x2   :  { %s184_s12 = scalar_lea.vmem %s8_s11, 16  ;;  %p189_p1 = scmp.lt.s32.totalorder %s8_s11, %s8_s11 }
   0x3   :  { %p185_p0 = scmp.ne.s32.totalorder %s8_s11, %s184_s12  ;;  %p190_p2 = scmp.lt.s32.totalorder %s184_s12, %s184_s12 }
   0x5   :  { %p191_p3 = por %p190_p2, %p189_p1 }
   0x7   :  { %p192_p4 = pnand %p191_p3, %p185_p0 }
   0x9   :  { %195 = shalt.err (!%p192_p4)  }
   0xa   :  { %s206_s13 = smov [#allocation3]  }
   0xb   :  { %10 = dma.vmem_to_smem %s8_s11, 16, %s206_s13, [#allocation2] }
   0xc   :  { %200 = dma.done.wait [#allocation2], 16 }
   0xd   :  { %201 = vsyncadd [#allocation2], 4294967280 }
   0xe   :  { %12 = sfence }
   0xf   :  { %s202_s14 = smov 0  }
  0x10 LB: > { %s168_s15 = sadd.s32 4294967295, %s204_s14   ;;  %p172_p5 = scmp.ge.s32.totalorder %s204_s14, 1  ;;  %s204_s14 = sphi %s202_s14, %s18_s14  }
  0x11   : > { %p96_p6 = scmp.lt.s32.totalorder %s204_s14, 11 }
  0x13   : > { %p97_p7 = pnand %p172_p5, %p96_p6 }
  0x14   : > { %s113_s0 = sld [smem:[#allocation3 + %s168_s15]] (!%p97_p7)  ;;  %p118_p8 = scmp.lt.s32.totalorder (!%p97_p7), %s168_s15, 9  ;;  %vm122_vm0 = vcmask (!%p97_p7), 24576  }
  0x15   : > { %100 = sbr.rel (%p97_p7) target bundleno = 32 (0x20), region = 24 }
  0x1a   : > { %p114_p9 = scmp.lt.s32.totalorder (!%p97_p7), %s113_s0, 511 }
  0x1c   : > { %s235_s15 = smov (!%p118_p8, %s168_s15), 9  ;;  %s237_s0 = smov (!%p114_p9, %s113_s0), 511 }
  0x1d   : > { %s120_s18 = scalar_lea.vmem %s233_s2, %s235_s15  ;;  %s116_s21 = scalar_lea.vmem %s232_s1, %s237_s0 }
  0x1e   : > { %v121_v0 = vld [vmem:[%s116_s21] sm:$0x1] }
  0x1f   : > { %123 = vst.msk [vmem:[%s120_s18] sm:$0x1] %vm122_vm0, %v121_v0 }
  0x20 PF: > { %s18_s14 = sadd.s32 1, %s204_s14  }
  0x21   : > { %p15_p10 = scmp.ge.s32.totalorder %s18_s14, 12  }
  0x23   :  { %17 = sbr.rel (!%p15_p10) target bundleno = 16 (0x10), region = 54 }

</bundles_post_ra>
